<compile_context>
chip_gen: v5e
topology: v5e:2x2
jax: 0.10.0
libtpu: 0.0.40
codegen_flags: <defaults>
</compile_context>

<pallas_src>
import functools

import jax
import jax.numpy as jnp
from jax.experimental import pallas as pl
from jax.experimental.pallas import tpu as pltpu

_LANES = 128
_SUBLANES = 8


def _round_up(x: int, m: int) -> int:
    return ((x + m - 1) // m) * m


def _device_defaults():
    """(num_splits, default_block_rows) tuned per TPU generation."""
    try:
        kind = jax.devices()[0].device_kind.lower()
    except Exception:
        kind = ""
    if "v7" in kind:
        # 2 TensorCores/chip, ~3.2 TB/s HBM: bigger tiles + 2-way split.
        # 2 inputs x 2 bufs x (8192,128) f32 = 16 MiB < 32 MiB scoped default.
        return 2, 8192
    # v5e / v6e: single TensorCore.  2 x 2 x (4096,128) f32 = 8 MiB fits
    # v5e's 16 MiB scoped-VMEM default.
    return 1, 4096


def _bpr_loss_kernel(pos_ref, neg_ref, out_ref, acc_ref, *,
                     gamma: float, blocks: int, bpp: int, block_rows: int,
                     rem_last: int, guard_steps: bool):
    # pos_ref/neg_ref: (block_rows, 128) input tiles (native dtype) in VMEM.
    # out_ref:         (1, 8, 128) f32 per-split partial sums.
    # acc_ref:         (8, 128) f32 VMEM accumulator scratch.
    p = pl.program_id(0)            # split axis ("parallel")
    i = pl.program_id(1)            # streaming reduction axis ("arbitrary")
    blk = p * bpp + i               # logical block index (bpp is static)

    @pl.when(i == 0)
    def _init():
        acc_ref[...] = jnp.zeros_like(acc_ref)

    # Cast to f32 in-kernel (bf16 inputs DMA half the bytes from HBM).
    pos = pos_ref[...].astype(jnp.float32)
    neg = neg_ref[...].astype(jnp.float32)
    e = jnp.exp(neg - pos)                        # EUP; sigmoid(pos-neg) = 1/(1+e)
    term = jnp.log(gamma + 1.0 / (1.0 + e))       # VPU div + EUP log

    def accumulate(t):
        # Sublane-group tree-sum into one (8,128) vreg: pure VPU adds.
        acc_ref[...] += t.reshape(-1, _SUBLANES, _LANES).sum(axis=0)

    full_tail = rem_last == block_rows * _LANES
    if full_tail and not guard_steps:
        accumulate(term)
    else:
        interior_hi = blocks if full_tail else blocks - 1

        @pl.when(blk < interior_hi)
        def _interior():
            accumulate(term)

        if not full_tail:
            # Mask only in the last logical block: padded tail elements and
            # out-of-bounds boundary rows both sit past `rem_last` (a static,
            # per-block count -- no global flat index, no int32 overflow).
            @pl.when(blk == blocks - 1)
            def _tail():
                row = jax.lax.broadcasted_iota(jnp.int32, (block_rows, _LANES), 0)
                lane = jax.lax.broadcasted_iota(jnp.int32, (block_rows, _LANES), 1)
                valid = row * _LANES + lane < rem_last
                accumulate(jnp.where(valid, term, 0.0))
        # Dead remainder-balancing steps (blk >= blocks) accumulate nothing.

    @pl.when(i == bpp - 1)
    def _finalize():
        out_ref[...] = acc_ref[...].reshape(1, _SUBLANES, _LANES)


def bpr_loss(pos_score: jax.Array, neg_score: jax.Array, gamma: float = 1e-10,
             *, block_rows: int | None = None, num_splits: int | None = None
             ) -> jax.Array:
    """Pallas-backed BPR loss: -mean(log(gamma + sigmoid(pos - neg)))."""
    assert pos_score.shape == neg_score.shape and pos_score.ndim == 1
    n = pos_score.shape[0]
    assert n > 0

    dflt_splits, dflt_rows = _device_defaults()
    if num_splits is None:
        num_splits = dflt_splits
    if block_rows is None:
        block_rows = dflt_rows

    rows = pl.cdiv(n, _LANES)
    padded_rows = _round_up(rows, _SUBLANES)                  # <= 7 extra rows
    block_rows = max(_SUBLANES,
                     min(_round_up(block_rows, _SUBLANES), padded_rows))

    blocks = pl.cdiv(padded_rows, block_rows)
    num_splits = max(1, min(num_splits, blocks))
    bpp = pl.cdiv(blocks, num_splits)
    guard_steps = (blocks % num_splits) != 0
    rem_last = n - (blocks - 1) * block_rows * _LANES         # valid elems in last block

    padded_n = padded_rows * _LANES

    def to_slab(x):
        # Pad at most one partial (8,128) tile; reshape is a free bitcast.
        if padded_n != n:
            x = jnp.pad(x, (0, padded_n - n))
        return x.reshape(padded_rows, _LANES)

    pos2d = to_slab(pos_score)        # native dtype: no host upcast
    neg2d = to_slab(neg_score)

    itemsize = jnp.dtype(pos_score.dtype).itemsize
    cost = pl.CostEstimate(
        flops=6 * padded_n,
        transcendentals=2 * padded_n,                          # exp + log
        bytes_accessed=2 * padded_n * itemsize
        + num_splits * _SUBLANES * _LANES * 4,
    )

    kernel = functools.partial(
        _bpr_loss_kernel, gamma=gamma, blocks=blocks, bpp=bpp,
        block_rows=block_rows, rem_last=rem_last, guard_steps=guard_steps)

    if guard_steps:
        # Balance the remainder across splits: the dead step re-uses the last
        # valid block (no extra DMA) and its accumulation is guarded off.
        in_map = lambda p, i: (jnp.minimum(p * bpp + i, blocks - 1), 0)
    else:
        in_map = lambda p, i: (p * bpp + i, 0)

    partials = pl.pallas_call(
        kernel,
        out_shape=jax.ShapeDtypeStruct((num_splits, _SUBLANES, _LANES),
                                       jnp.float32),
        grid_spec=pltpu.PrefetchScalarGridSpec(
            num_scalar_prefetch=0,
            grid=(num_splits, bpp),
            in_specs=[
                pl.BlockSpec((block_rows, _LANES), in_map),
                pl.BlockSpec((block_rows, _LANES), in_map),
            ],
            out_specs=pl.BlockSpec((1, _SUBLANES, _LANES),
                                   lambda p, i: (p, 0, 0)),
            scratch_shapes=[pltpu.VMEM((_SUBLANES, _LANES), jnp.float32)],
        ),
        compiler_params=pltpu.CompilerParams(
            dimension_semantics=("parallel", "arbitrary")),
        cost_estimate=cost,
    )(pos2d, neg2d)

    # Combine per-split, per-lane partial sums; negate and divide by true N.
    return -(jnp.sum(partials) / n)


def _reference(pos_score, neg_score, gamma=1e-10):
    d = pos_score.astype(jnp.float32) - neg_score.astype(jnp.float32)
    return -jnp.mean(jnp.log(gamma + jax.nn.sigmoid(d)))


if __name__ == "__main__":
    key = jax.random.PRNGKey(0)
    k1, k2 = jax.random.split(key)

    N = 4000  # not a multiple of 128 -> exercises the masked tail
    pos_score = jax.random.normal(k1, (N,), dtype=jnp.float32)
    neg_score = jax.random.normal(k2, (N,), dtype=jnp.float32)
    ref = _reference(pos_score, neg_score)

    # Small-N fast path: single block, single split.
    loss = bpr_loss(pos_score, neg_score)
    jax.block_until_ready(loss)
    assert jnp.allclose(loss, ref, atol=1e-5, rtol=1e-5), (loss, ref)

    # Multi-step streaming accumulation path (several inner grid steps).
    loss2 = bpr_loss(pos_score, neg_score, block_rows=8)
    jax.block_until_ready(loss2)
    assert jnp.allclose(loss2, ref, atol=1e-5, rtol=1e-5), (loss2, ref)

    # Odd block count + forced 2-way split: exercises the remainder-balancing
    # guard and clamped index_map (v7x megacore path; correct on any chip).
    N3 = 2500
    pos3 = jax.random.normal(k1, (N3,), dtype=jnp.float32)
    neg3 = jax.random.normal(k2, (N3,), dtype=jnp.float32)
    ref3 = _reference(pos3, neg3)
    loss3 = bpr_loss(pos3, neg3, block_rows=8, num_splits=2)
    jax.block_until_ready(loss3)
    assert jnp.allclose(loss3, ref3, atol=1e-5, rtol=1e-5), (loss3, ref3)

    # Ragged boundary block (rows not a multiple of block_rows).
    loss4 = bpr_loss(pos3, neg3, block_rows=16, num_splits=1)
    jax.block_until_ready(loss4)
    assert jnp.allclose(loss4, ref3, atol=1e-5, rtol=1e-5), (loss4, ref3)

    print("KERNEL_OK")
</pallas_src>

<mosaic_0001>
module attributes {stable_mosaic.version = 11 : i64} {
  func.func @_bpr_loss_kernel(%arg0: i32, %arg1: i32, %arg2: memref<32x128xf32, #tpu.memory_space<vmem>>, %arg3: memref<32x128xf32, #tpu.memory_space<vmem>>, %arg4: memref<1x8x128xf32, #tpu.memory_space<vmem>>, %arg5: memref<8x128xf32, #tpu.memory_space<vmem>>) attributes {dimension_semantics = [#tpu.dimension_semantics<parallel>, #tpu.dimension_semantics<arbitrary>], iteration_bounds = array<i64: 1, 1>, scalar_prefetch = 0 : i64, scratch_operands = 1 : i64, tpu.core_type = #tpu.core_type<tc>, window_params = [{transform_indices = @transform_0, window_bounds = array<i64: 32, 128>}, {transform_indices = @transform_1, window_bounds = array<i64: 32, 128>}, {transform_indices = @transform_2, window_bounds = array<i64: 1, 8, 128>}]} {
    %c1_i32 = arith.constant 1 : i32
    %0 = arith.muli %arg0, %c1_i32 : i32
    %1 = arith.addi %0, %arg1 : i32
    %c0_i32 = arith.constant 0 : i32
    %2 = arith.cmpi eq, %arg1, %c0_i32 : i32
    %3 = arith.extui %2 : i1 to i32
    %c0_i32_0 = arith.constant 0 : i32
    %4 = arith.cmpi ne, %3, %c0_i32_0 : i32
    scf.if %4 {
      %cst_12 = arith.constant 0.000000e+00 : f32
      %25 = vector.broadcast %cst_12 : f32 to vector<8x128xf32>
      %c0_13 = arith.constant 0 : index
      %c0_14 = arith.constant 0 : index
      %26 = vector.load %arg5[%c0_13, %c0_14] : memref<8x128xf32, #tpu.memory_space<vmem>>, vector<8x128xf32>
      tpu.vector_store %arg5[%c0_13, %c0_14], %25 {strides = array<i32>} : memref<8x128xf32, #tpu.memory_space<vmem>>, vector<8x128xf32>,
    } else {
    }
    %c0 = arith.constant 0 : index
    %c0_1 = arith.constant 0 : index
    %5 = vector.load %arg2[%c0, %c0_1] : memref<32x128xf32, #tpu.memory_space<vmem>>, vector<32x128xf32>
    %c0_2 = arith.constant 0 : index
    %c0_3 = arith.constant 0 : index
    %6 = vector.load %arg3[%c0_2, %c0_3] : memref<32x128xf32, #tpu.memory_space<vmem>>, vector<32x128xf32>
    %7 = arith.subf %6, %5 : vector<32x128xf32>
    %8 = math.exp %7 : vector<32x128xf32>
    %cst = arith.constant 1.000000e+00 : f32
    %9 = vector.broadcast %cst : f32 to vector<32x128xf32>
    %10 = arith.addf %9, %8 : vector<32x128xf32>
    %cst_4 = arith.constant 1.000000e+00 : f32
    %11 = vector.broadcast %cst_4 : f32 to vector<32x128xf32>
    %12 = arith.divf %11, %10 : vector<32x128xf32>
    %cst_5 = arith.constant 1.000000e-10 : f32
    %13 = vector.broadcast %cst_5 : f32 to vector<32x128xf32>
    %14 = arith.addf %13, %12 : vector<32x128xf32>
    %15 = math.log %14 : vector<32x128xf32>
    %c0_i32_6 = arith.constant 0 : i32
    %16 = arith.cmpi slt, %1, %c0_i32_6 : i32
    %17 = arith.extui %16 : i1 to i32
    %c0_i32_7 = arith.constant 0 : i32
    %18 = arith.cmpi ne, %17, %c0_i32_7 : i32
    scf.if %18 {
      %c0_12 = arith.constant 0 : index
      %c0_13 = arith.constant 0 : index
      %25 = vector.load %arg5[%c0_12, %c0_13] : memref<8x128xf32, #tpu.memory_space<vmem>>, vector<8x128xf32>
      %26 = vector.shape_cast %15 : vector<32x128xf32> to vector<4x8x128xf32>
      %cst_14 = arith.constant dense<0.000000e+00> : vector<8x128xf32>
      %27 = vector.multi_reduction <add>, %26, %cst_14 [0] : vector<4x8x128xf32> to vector<8x128xf32>
      %28 = arith.addf %25, %27 : vector<8x128xf32>
      %c0_15 = arith.constant 0 : index
      %c0_16 = arith.constant 0 : index
      %29 = vector.load %arg5[%c0_15, %c0_16] : memref<8x128xf32, #tpu.memory_space<vmem>>, vector<8x128xf32>
      tpu.vector_store %arg5[%c0_15, %c0_16], %28 {strides = array<i32>} : memref<8x128xf32, #tpu.memory_space<vmem>>, vector<8x128xf32>,
    } else {
    }
    %c0_i32_8 = arith.constant 0 : i32
    %19 = arith.cmpi eq, %1, %c0_i32_8 : i32
    %20 = arith.extui %19 : i1 to i32
    %c0_i32_9 = arith.constant 0 : i32
    %21 = arith.cmpi ne, %20, %c0_i32_9 : i32
    scf.if %21 {
      %25 = tpu.iota {dimensions = array<i32: 0>} : vector<32x128xi32>
      %26 = tpu.iota {dimensions = array<i32: 1>} : vector<32x128xi32>
      %c128_i32 = arith.constant 128 : i32
      %27 = vector.broadcast %c128_i32 : i32 to vector<32x128xi32>
      %28 = arith.muli %25, %27 : vector<32x128xi32>
      %29 = arith.addi %28, %26 : vector<32x128xi32>
      %c4000_i32 = arith.constant 4000 : i32
      %30 = vector.broadcast %c4000_i32 : i32 to vector<32x128xi32>
      %31 = arith.cmpi slt, %29, %30 : vector<32x128xi32>
      %cst_12 = arith.constant 0.000000e+00 : f32
      %32 = vector.broadcast %cst_12 : f32 to vector<32x128xf32>
      %33 = arith.select %31, %15, %32 : vector<32x128xi1>, vector<32x128xf32>
      %c0_13 = arith.constant 0 : index
      %c0_14 = arith.constant 0 : index
      %34 = vector.load %arg5[%c0_13, %c0_14] : memref<8x128xf32, #tpu.memory_space<vmem>>, vector<8x128xf32>
      %35 = vector.shape_cast %33 : vector<32x128xf32> to vector<4x8x128xf32>
      %cst_15 = arith.constant dense<0.000000e+00> : vector<8x128xf32>
      %36 = vector.multi_reduction <add>, %35, %cst_15 [0] : vector<4x8x128xf32> to vector<8x128xf32>
      %37 = arith.addf %34, %36 : vector<8x128xf32>
      %c0_16 = arith.constant 0 : index
      %c0_17 = arith.constant 0 : index
      %38 = vector.load %arg5[%c0_16, %c0_17] : memref<8x128xf32, #tpu.memory_space<vmem>>, vector<8x128xf32>
      tpu.vector_store %arg5[%c0_16, %c0_17], %37 {strides = array<i32>} : memref<8x128xf32, #tpu.memory_space<vmem>>, vector<8x128xf32>,
    } else {
    }
    %c0_i32_10 = arith.constant 0 : i32
    %22 = arith.cmpi eq, %arg1, %c0_i32_10 : i32
    %23 = arith.extui %22 : i1 to i32
    %c0_i32_11 = arith.constant 0 : i32
    %24 = arith.cmpi ne, %23, %c0_i32_11 : i32
    scf.if %24 {
      %c0_12 = arith.constant 0 : index
      %c0_13 = arith.constant 0 : index
      %25 = vector.load %arg5[%c0_12, %c0_13] : memref<8x128xf32, #tpu.memory_space<vmem>>, vector<8x128xf32>
      %26 = vector.shape_cast %25 : vector<8x128xf32> to vector<1x8x128xf32>
      %c0_14 = arith.constant 0 : index
      %c0_15 = arith.constant 0 : index
      %c0_16 = arith.constant 0 : index
      %27 = vector.load %arg4[%c0_14, %c0_15, %c0_16] : memref<1x8x128xf32, #tpu.memory_space<vmem>>, vector<1x8x128xf32>
      tpu.vector_store %arg4[%c0_14, %c0_15, %c0_16], %26 {strides = array<i32>} : memref<1x8x128xf32, #tpu.memory_space<vmem>>, vector<1x8x128xf32>,
    } else {
    }
    return
  }
  func.func @transform_0(%arg0: i32, %arg1: i32) -> (i32, i32) {
    %c1_i32 = arith.constant 1 : i32
    %0 = arith.muli %arg0, %c1_i32 : i32
    %1 = arith.addi %0, %arg1 : i32
    %c0_i32 = arith.constant 0 : i32
    %c0_i32_0 = arith.constant 0 : i32
    return %1, %c0_i32 : i32, i32
  }
  func.func @transform_1(%arg0: i32, %arg1: i32) -> (i32, i32) {
    %c1_i32 = arith.constant 1 : i32
    %0 = arith.muli %arg0, %c1_i32 : i32
    %1 = arith.addi %0, %arg1 : i32
    %c0_i32 = arith.constant 0 : i32
    %c0_i32_0 = arith.constant 0 : i32
    return %1, %c0_i32 : i32, i32
  }
  func.func @transform_2(%arg0: i32, %arg1: i32) -> (i32, i32, i32) {
    %c0_i32 = arith.constant 0 : i32
    %c0_i32_0 = arith.constant 0 : i32
    %c0_i32_1 = arith.constant 0 : i32
    return %arg0, %c0_i32, %c0_i32_0 : i32, i32, i32
  }
}

</mosaic_0001>

<bundles_post_ra>
// kernel: tpu_custom_call.1
= control target key start
LH: loop header
LB: loop body
LE: loop exit
PB: predicated region body
PF: predicated region fallthrough
CT: control target
= control target key end

     0   :  { %7 = vsyncpa [#allocation4], 0  ;;  %s408_s0 = inlined_call_operand.hbm [shape: f32[32,128], index: 0, kind: input, shape index: {}]   ;;  %s409_s1 = inlined_call_operand.hbm [shape: f32[32,128], index: 1, kind: input, shape index: {}]   ;;  %s410_s2 = inlined_call_operand.hbm [shape: f32[1,8,128], index: 2, kind: output, shape index: {}]  }
   0x1   :  { %8 = vsyncpa [#allocation7], 0 }
   0x2   :  { %9 = vsyncpa [#allocation5], 0  ;;  %s18_s11 = sshll.u32 %s408_s0, 4  ;;  %s331_s12 = smov [#allocation3]   ;;  %s19_s11 = int_to_ptr.hbm [resolvable:$true] %s18_s11 }
   0x3   :  { %s20_s13 = sshll.u32 %s331_s12, 4  ;;  %s35_s16 = sshll.u32 %s409_s1, 4  ;;  %s21_s13 = int_to_ptr.vmem [resolvable:$true] %s20_s13  ;;  %s36_s16 = int_to_ptr.hbm [resolvable:$true] %s35_s16 }
   0x4   :  { %s332_s17 = smov 128   ;;  %s333_s18 = smov 8  }
   0x5   :  { %26 = dma.hbm_to_vmem [thread:$0]  %s19_s11, 512, %s21_s13, [#allocation4], %s332_s17, %s332_s17, %s333_s18  }
   0x6   :  { %s334_s19 = smov [#allocation6]  }
   0x7   :  { %s37_s20 = sshll.u32 %s334_s19, 4  ;;  %s38_s20 = int_to_ptr.vmem [resolvable:$true] %s37_s20 }
   0x8   :  { %43 = dma.hbm_to_vmem [thread:$0]  %s36_s16, 512, %s38_s20, [#allocation7], %s332_s17, %s332_s17, %s333_s18  }
   0x9   :  { %325 = dma.done.wait [#allocation4], 512  }
   0xa   :  { %326 = vsyncadd [#allocation4], 4294966784 }
   0xb   :  { %327 = dma.done.wait [#allocation7], 512  }
   0xc   :  { %328 = vsyncadd [#allocation7], 4294966784  ;;  %v62_v0 = vld [vmem:[#allocation3] sm:$0xff]  ;;  %v63_v1 = vld [vmem:[#allocation3 + $0x8] sm:$0xff]  ;;  %v172_v17 = vlaneseq  ;;  %s335_s0 = smov [#allocation8]   ;;  %s213_s23 = sshll.u32 %s410_s2, 4  ;;  %s214_s23 = int_to_ptr.hbm [resolvable:$true] %s213_s23 }
   0xd   :  { %v64_v2 = vld [vmem:[#allocation3 + $0x10] sm:$0xff]  ;;  %v65_v3 = vld [vmem:[#allocation3 + $0x18] sm:$0xff]  ;;  %v66_v4 = vld [vmem:[#allocation6] sm:$0xff]  ;;  %s211_s1 = sshll.u32 %s335_s0, 4  ;;  %s212_s1 = int_to_ptr.vmem [resolvable:$true] %s211_s1 }
   0xe   :  { %v67_v5 = vld [vmem:[#allocation6 + $0x8] sm:$0xff]  ;;  %v68_v6 = vld [vmem:[#allocation6 + $0x10] sm:$0xff]  ;;  %v69_v7 = vld [vmem:[#allocation6 + $0x18] sm:$0xff]  ;;  %v70_v8 = vsub.f32 %v66_v4, %v62_v0  ;;  %v357_v25 = vshrl.u32 %v172_v17, 7  ;;  %v365_v32 = vand.u32 127, %v172_v17 }
   0xf   :  { %v71_v9 = vsub.f32 %v67_v5, %v63_v1  ;;  %v72_v10 = vsub.f32 %v68_v6, %v64_v2  ;;  %v73_v11 = vsub.f32 %v69_v7, %v65_v3 }
  0x10   :  { %v74_v12 = vmul.f32 1.442695, %v70_v8  ;;  %v360_v28 = vadd.s32 8, %v357_v25  ;;  %v363_v31 = vadd.s32 16, %v357_v25  ;;  %v179_v33 = vmul.u32 128, %v357_v25 }
  0x11   :  { %v76_v13 = vmul.f32 1.442695, %v71_v9  ;;  %v78_v14 = vmul.f32 1.442695, %v72_v10  ;;  %v80_v15 = vmul.f32 1.442695, %v73_v11 }
  0x12   :  { %229 = vpow2.f32 %v74_v12  ;;  %v176_v62 = vadd.s32 24, %v357_v25  ;;  %v180_v11 = vmul.u32 128, %v360_v28 }
  0x13   :  { %231 = vpow2.f32 %v76_v13 }
  0x14   :  { %233 = vpow2.f32 %v78_v14  ;;  %v181_v14 = vmul.u32 128, %v363_v31  ;;  %v182_v17 = vmul.u32 128, %v176_v62 }
  0x15   :  { %235 = vpow2.f32 %v80_v15 }
  0x18   :  { %v230_v16 = vpop.eup %229 }
  0x19   :  { %v232_v18 = vpop.eup %231  ;;  %v82_v19 = vadd.f32 1.0, %v230_v16 }
  0x1a   :  { %v234_v20 = vpop.eup %233  ;;  %v83_v21 = vadd.f32 1.0, %v232_v18  ;;  %v183_v18 = vadd.s32 %v179_v33, %v365_v32 }
  0x1b   :  { %v236_v22 = vpop.eup %235  ;;  %v84_v23 = vadd.f32 1.0, %v234_v20  ;;  %237 = vrcp.f32 %v82_v19  ;;  %v95_v26 = vand.u32 2147483647, %v82_v19  ;;  %v97_v27 = vand.u32 2147483648, %v82_v19 }
  0x1c   :  { %v85_v24 = vadd.f32 1.0, %v236_v22  ;;  %239 = vrcp.f32 %v83_v21  ;;  %v112_v30 = vand.u32 2147483648, %v83_v21  ;;  %vm91_vm0 = vweird.f32 %v82_v19 }
  0x1d   :  { %241 = vrcp.f32 %v84_v23  ;;  %vm368_vm1 = vcmp.eq.f32.partialorder %v95_v26, 8.507059e+37  ;;  %vm106_vm2 = vweird.f32 %v83_v21  ;;  %v98_v38 = vor.u32 1.1754944e-38, %v97_v27 }
  0x1e   :  { %243 = vrcp.f32 %v85_v24  ;;  %v110_v40 = vand.u32 2147483647, %v83_v21  ;;  %vm121_vm3 = vweird.f32 %v84_v23  ;;  %v125_v43 = vand.u32 2147483647, %v84_v23 }
  0x1f   :  { %v113_v46 = vor.u32 1.1754944e-38, %v112_v30  ;;  %v127_v47 = vand.u32 2147483648, %v84_v23  ;;  %vm136_vm8 = vweird.f32 %v85_v24  ;;  %v140_v53 = vand.u32 2147483647, %v85_v24 }
  0x20   :  { %v142_v54 = vand.u32 2147483648, %v85_v24  ;;  %vm111_vm11 = vcmp.eq.f32.partialorder %v110_v40, 8.507059e+37  ;;  %vm126_vm13 = vcmp.eq.f32.partialorder %v125_v43, 8.507059e+37  ;;  %v185_v20 = vadd.s32 %v181_v14, %v365_v32 }
  0x21   :  { %v238_v29 = vpop.eup %237  ;;  %v128_v61 = vor.u32 1.1754944e-38, %v127_v47  ;;  %vm141_vm15 = vcmp.eq.f32.partialorder %v140_v53, 8.507059e+37  ;;  %v186_v22 = vadd.s32 %v182_v17, %v365_v32 }
  0x22   :  { %v240_v34 = vpop.eup %239  ;;  %v87_v35 = vmul.f32 %v238_v29, %v82_v19  ;;  %vm92_vm4 = vweird.f32 %v238_v29  ;;  %v143_v4 = vor.u32 1.1754944e-38, %v142_v54  ;;  %v184_v19 = vadd.s32 %v180_v11, %v365_v32 }
  0x23   :  { %v242_v37 = vpop.eup %241  ;;  %v102_v39 = vmul.f32 %v240_v34, %v83_v21  ;;  %vm107_vm5 = vweird.f32 %v240_v34  ;;  %vm373_vm7 = vmor %vm91_vm0, %vm92_vm4  ;;  %vm187_vm0 = vcmp.lt.s32.totalorder %v183_v18, 4000 }
  0x24   :  { %v88_v41 = vsub.f32 1.0, %v87_v35  ;;  %v117_v42 = vmul.f32 %v242_v37, %v84_v23  ;;  %v244_v44 = vpop.eup %243  ;;  %vm122_vm6 = vweird.f32 %v242_v37  ;;  %vm378_vm9 = vmor %vm106_vm2, %vm107_vm5  ;;  %vm189_vm2 = vcmp.lt.s32.totalorder %v185_v20, 4000 }
  0x25   :  { %v103_v45 = vsub.f32 1.0, %v102_v39  ;;  %v132_v50 = vmul.f32 %v244_v44, %v85_v24  ;;  %vm137_vm10 = vweird.f32 %v244_v44  ;;  %vm383_vm12 = vmor %vm121_vm3, %vm122_vm6  ;;  %vm190_vm3 = vcmp.lt.s32.totalorder %v186_v22, 4000 }
  0x26   :  { %v89_v48 = vmul.f32 %v238_v29, %v88_v41  ;;  %v118_v49 = vsub.f32 1.0, %v117_v42  ;;  %vm138_vm14 = vmor %vm136_vm8, %vm137_vm10 }
  0x27   :  { %v104_v52 = vmul.f32 %v240_v34, %v103_v45  ;;  %v133_v58 = vsub.f32 1.0, %v132_v50 }
  0x28   :  { %v90_v55 = vadd.f32 %v238_v29, %v89_v48  ;;  %v119_v57 = vmul.f32 %v242_v37, %v118_v49 }
  0x29   :  { %v105_v59 = vadd.f32 %v240_v34, %v104_v52  ;;  %v134_v1 = vmul.f32 %v244_v44, %v133_v58 }
  0x2a   :  { %v94_v63 = vsel %vm373_vm7, %v238_v29, %v90_v55  ;;  %v120_v0 = vadd.f32 %v242_v37, %v119_v57 }
  0x2b   :  { %v99_v2 = vsel %vm368_vm1, %v98_v38, %v94_v63  ;;  %v109_v3 = vsel %vm378_vm9, %v240_v34, %v105_v59  ;;  %v135_v7 = vadd.f32 %v244_v44, %v134_v1  ;;  %vm188_vm1 = vcmp.lt.s32.totalorder %v184_v19, 4000 }
  0x2c   :  { %v114_v5 = vsel %vm111_vm11, %v113_v46, %v109_v3  ;;  %v124_v6 = vsel %vm383_vm12, %v242_v37, %v120_v0  ;;  %v146_v8 = vadd.f32 1e-10, %v99_v2 }
  0x2d   :  { %v129_v9 = vsel %vm126_vm13, %v128_v61, %v124_v6  ;;  %v147_v10 = vadd.f32 1e-10, %v114_v5  ;;  %v139_v12 = vsel %vm138_vm14, %v244_v44, %v135_v7 }
  0x2e   :  { %v148_v13 = vadd.f32 1e-10, %v129_v9  ;;  %245 = vlog2.f32 %v146_v8  ;;  %v144_v15 = vsel %vm141_vm15, %v143_v4, %v139_v12 }
  0x2f   :  { %247 = vlog2.f32 %v147_v10  ;;  %v149_v16 = vadd.f32 1e-10, %v144_v15 }
  0x30   :  { %249 = vlog2.f32 %v148_v13 }
  0x31   :  { %251 = vlog2.f32 %v149_v16 }
  0x34   :  { %v246_v21 = vpop.eup %245 }
  0x35   :  { %v248_v23 = vpop.eup %247  ;;  %v151_v24 = vmul.f32 0.6931472, %v246_v21 }
  0x36   :  { %v250_v26 = vpop.eup %249  ;;  %v153_v27 = vmul.f32 0.6931472, %v248_v23 }
  0x37   :  { %v155_v28 = vmul.f32 0.6931472, %v250_v26  ;;  %v191_v29 = vsel %vm187_vm0, %v151_v24, 0.0  ;;  %v252_v30 = vpop.eup %251 }
  0x38   :  { %v192_v25 = vsel %vm188_vm1, %v153_v27, 0.0  ;;  %v157_v31 = vmul.f32 0.6931472, %v252_v30 }
  0x39   :  { %v193_v33 = vsel %vm189_vm2, %v155_v28, 0.0  ;;  %v196_v34 = vadd.f32 %v192_v25, %v191_v29 }
  0x3a   :  { %v194_v32 = vsel %vm190_vm3, %v157_v31, 0.0 }
  0x3b   :  { %v197_v35 = vadd.f32 %v196_v34, %v193_v33 }
  0x3d   :  { %v198_v36 = vadd.f32 %v197_v35, %v194_v32 }
  0x3f   :  { %205 = vst [vmem:[#allocation8] sm:$0xff] %v198_v36 }
  0x40   :  { %216 = dma.vmem_to_hbm [thread:$0]  %s212_s1, 128, %s214_s23, [#allocation5]  }
  0x41   :  { %329 = dma.done.wait [#allocation5], 128  }
  0x42   :  { %330 = vsyncadd [#allocation5], 4294967168 }
  0x43   :  { %221 = vsyncpa [#allocation4], 1 }
  0x44   :  { %222 = vsyncpa [#allocation7], 1 }
  0x45   :  { %223 = vsyncpa [#allocation5], 1 }

</bundles_post_ra>
